<compile_context>
chip_gen: v6e
topology: v6e:2x2x1
jax: 0.10.0
libtpu: 0.0.40
codegen_flags: <defaults>
</compile_context>

<pallas_src>
import functools

import jax
import jax.numpy as jnp
from jax.experimental import pallas as pl
from jax.experimental.pallas import tpu as pltpu


_LANES = 128     # output width padded to a multiple of this (lane-dense stores)
_SUBLANES = 8    # batch tile must be a multiple of this


def _round_up(x, m):
    return (x + m - 1) // m * m


def _linear_kernel(x_ref, w_ref, b_ref, o_ref):
    """out = x @ W_t + b computed on the VPU (no MXU).

    x_ref: [TB, in_size]      (in_size is tiny, fixed to 2 by the module)
    w_ref: [in_size, N_pad]   (row k holds weight[:, k], zero-padded on lanes)
    b_ref: [1, N_pad]
    o_ref: [TB, N_pad]
    """
    x = x_ref[...].astype(jnp.float32)     # in-kernel upcast (v5e-safe bf16 path)
    w = w_ref[...].astype(jnp.float32)
    acc = b_ref[...].astype(jnp.float32)   # [1, N_pad], broadcasts over sublanes
    in_size = x_ref.shape[1]
    # Unrolled VPU multiply-add: acc += x[:, k] (lane-bcast) * w[k, :] (sublane-bcast)
    for k in range(in_size):
        acc = acc + x[:, k:k + 1] * w[k:k + 1, :]
    o_ref[...] = acc.astype(o_ref.dtype)


@functools.partial(jax.jit, static_argnames=("block_b",))
def classification_net_forward(x, weight, bias, *, block_b=512):
    """Pallas equivalent of torch.nn.Linear: out = x @ weight.T + bias.

    x:      [B, in_size]
    weight: [num_class, in_size]  (PyTorch layout)
    bias:   [num_class]
    """
    B, in_size = x.shape
    num_class = weight.shape[0]

    # Lane-dense padded width for output / weight / bias.
    n_pad = _round_up(max(num_class, 1), _LANES)

    # One-time tiny parameter prep (fused by XLA, not on the kernel hot path):
    # w_pad[k, c] = weight[c, k] for c < num_class, else 0.
    w_pad = jnp.zeros((in_size, n_pad), x.dtype).at[:, :num_class].set(
        jnp.swapaxes(weight, 0, 1).astype(x.dtype))
    b_pad = jnp.zeros((1, n_pad), x.dtype).at[:, :num_class].set(
        bias.astype(x.dtype))

    # Batch tiling: largest tile up to block_b, multiple of 8 sublanes.
    tb = min(_round_up(B, _SUBLANES), _round_up(block_b, _SUBLANES))
    b_rows = _round_up(B, tb)
    if b_rows != B:
        x = jnp.pad(x, ((0, b_rows - B), (0, 0)))
    grid = (b_rows // tb,)

    out = pl.pallas_call(
        _linear_kernel,
        out_shape=jax.ShapeDtypeStruct((b_rows, n_pad), x.dtype),
        grid_spec=pltpu.PrefetchScalarGridSpec(
            num_scalar_prefetch=0,
            grid=grid,
            in_specs=[
                pl.BlockSpec((tb, in_size), lambda i: (i, 0)),     # streamed
                pl.BlockSpec((in_size, n_pad), lambda i: (0, 0)),  # resident
                pl.BlockSpec((1, n_pad), lambda i: (0, 0)),        # resident
            ],
            out_specs=pl.BlockSpec((tb, n_pad), lambda i: (i, 0)),
        ),
        compiler_params=pltpu.CompilerParams(
            dimension_semantics=("parallel",),   # shard batch tiles across TCs (v7x)
            vmem_limit_bytes=32 * 1024 * 1024,   # stays within v7x's smaller VMEM
        ),
    )(x, w_pad, b_pad)

    # Slice off batch + lane padding.
    return out[:B, :num_class]


if __name__ == "__main__":
    # Config implied by the module: in_size = 2 (fixed), num_class from config.
    in_size = 2
    num_class = 4
    batch = 8

    key = jax.random.PRNGKey(0)
    kx, kw, kb = jax.random.split(key, 3)

    # Deterministic init mimicking PyTorch Linear's U(-1/sqrt(in), 1/sqrt(in)).
    bound = 1.0 / (in_size ** 0.5)
    weight = jax.random.uniform(kw, (num_class, in_size), jnp.float32, -bound, bound)
    bias = jax.random.uniform(kb, (num_class,), jnp.float32, -bound, bound)
    x = jax.random.normal(kx, (batch, in_size), jnp.float32)

    out = classification_net_forward(x, weight, bias)
    out = jax.block_until_ready(out)

    # Reference check against plain JAX (same math as torch.nn.Linear).
    ref = x @ weight.T + bias
    assert out.shape == (batch, num_class), out.shape
    assert jnp.allclose(out, ref, atol=1e-5, rtol=1e-5)

    print("KERNEL_OK")
</pallas_src>

<mosaic_0001>
module attributes {stable_mosaic.version = 11 : i64} {
  func.func @_linear_kernel(%arg0: i32, %arg1: memref<8x2xf32, #tpu.memory_space<vmem>>, %arg2: memref<2x128xf32, #tpu.memory_space<vmem>>, %arg3: memref<1x128xf32, #tpu.memory_space<vmem>>, %arg4: memref<8x128xf32, #tpu.memory_space<vmem>>) attributes {dimension_semantics = [#tpu.dimension_semantics<parallel>], iteration_bounds = array<i64: 1>, scalar_prefetch = 0 : i64, scratch_operands = 0 : i64, tpu.core_type = #tpu.core_type<tc>, window_params = [{transform_indices = @transform_0, window_bounds = array<i64: 8, 2>}, {pipeline_mode = #tpu.pipeline_mode<synchronous>, transform_indices = @transform_1, window_bounds = array<i64: 2, 128>}, {pipeline_mode = #tpu.pipeline_mode<synchronous>, transform_indices = @transform_2, window_bounds = array<i64: 1, 128>}, {transform_indices = @transform_3, window_bounds = array<i64: 8, 128>}]} {
    %c0 = arith.constant 0 : index
    %c0_0 = arith.constant 0 : index
    %0 = vector.load %arg1[%c0, %c0_0] : memref<8x2xf32, #tpu.memory_space<vmem>>, vector<8x2xf32>
    %c0_1 = arith.constant 0 : index
    %c0_2 = arith.constant 0 : index
    %1 = vector.load %arg2[%c0_1, %c0_2] : memref<2x128xf32, #tpu.memory_space<vmem>>, vector<2x128xf32>
    %c0_3 = arith.constant 0 : index
    %c0_4 = arith.constant 0 : index
    %2 = vector.load %arg3[%c0_3, %c0_4] : memref<1x128xf32, #tpu.memory_space<vmem>>, vector<1x128xf32>
    %3 = vector.extract_strided_slice %0 {offsets = [0, 0], sizes = [8, 1], strides = [1, 1]} : vector<8x2xf32> to vector<8x1xf32>
    %4 = vector.extract_strided_slice %1 {offsets = [0, 0], sizes = [1, 128], strides = [1, 1]} : vector<2x128xf32> to vector<1x128xf32>
    %5 = vector.broadcast %3 : vector<8x1xf32> to vector<8x128xf32>
    %6 = vector.broadcast %4 : vector<1x128xf32> to vector<8x128xf32>
    %7 = arith.mulf %5, %6 : vector<8x128xf32>
    %8 = vector.broadcast %2 : vector<1x128xf32> to vector<8x128xf32>
    %9 = arith.addf %8, %7 : vector<8x128xf32>
    %10 = vector.extract_strided_slice %0 {offsets = [0, 1], sizes = [8, 1], strides = [1, 1]} : vector<8x2xf32> to vector<8x1xf32>
    %11 = vector.extract_strided_slice %1 {offsets = [1, 0], sizes = [1, 128], strides = [1, 1]} : vector<2x128xf32> to vector<1x128xf32>
    %12 = vector.broadcast %10 : vector<8x1xf32> to vector<8x128xf32>
    %13 = vector.broadcast %11 : vector<1x128xf32> to vector<8x128xf32>
    %14 = arith.mulf %12, %13 : vector<8x128xf32>
    %15 = arith.addf %9, %14 : vector<8x128xf32>
    %c0_5 = arith.constant 0 : index
    %c0_6 = arith.constant 0 : index
    %16 = vector.load %arg4[%c0_5, %c0_6] : memref<8x128xf32, #tpu.memory_space<vmem>>, vector<8x128xf32>
    tpu.vector_store %arg4[%c0_5, %c0_6], %15 {strides = array<i32>} : memref<8x128xf32, #tpu.memory_space<vmem>>, vector<8x128xf32>,
    return
  }
  func.func @transform_0(%arg0: i32) -> (i32, i32) {
    %c0_i32 = arith.constant 0 : i32
    %c0_i32_0 = arith.constant 0 : i32
    return %arg0, %c0_i32 : i32, i32
  }
  func.func @transform_1(%arg0: i32) -> (i32, i32) {
    %c0_i32 = arith.constant 0 : i32
    %c0_i32_0 = arith.constant 0 : i32
    %c0_i32_1 = arith.constant 0 : i32
    return %c0_i32, %c0_i32_0 : i32, i32
  }
  func.func @transform_2(%arg0: i32) -> (i32, i32) {
    %c0_i32 = arith.constant 0 : i32
    %c0_i32_0 = arith.constant 0 : i32
    %c0_i32_1 = arith.constant 0 : i32
    return %c0_i32, %c0_i32_0 : i32, i32
  }
  func.func @transform_3(%arg0: i32) -> (i32, i32) {
    %c0_i32 = arith.constant 0 : i32
    %c0_i32_0 = arith.constant 0 : i32
    return %arg0, %c0_i32 : i32, i32
  }
}

</mosaic_0001>

<bundles_post_ra>
// kernel: classification_net_forward.1
= control target key start
LH: loop header
LB: loop body
LE: loop exit
PB: predicated region body
PF: predicated region fallthrough
CT: control target
= control target key end

     0   :  { %v54_v0 = vmov 0   ;;  %v55_v2 = vmov 1   ;;  %v22_v3 = vlaneseq  ;;  %s88_s0 = inlined_call_operand.vmem [shape: f32[8,2], index: 0, kind: input, shape index: {}]   ;;  %s89_s1 = inlined_call_operand.vmem [shape: f32[2,128], index: 1, kind: input, shape index: {}]   ;;  %s90_s2 = inlined_call_operand.vmem [shape: f32[1,128], index: 2, kind: input, shape index: {}]   ;;  %s91_s3 = inlined_call_operand.vmem [shape: f32[8,128], index: 3, kind: output, shape index: {}]  }
   0x1   :  { %52 = vset.pattern.permute.xlu0 %v54_v0  ;;  %v14_v1 = vld [vmem:[%s88_s0] sm:$0xff] }
   0x2   :  { %19 = vperm.xlu0 %52, %v14_v1   ;;  %v23_v4 = vshrl.u32 %v22_v3, 7  ;;  %v15_v6 = vld [vmem:[%s89_s1] sm:$0x3] }
   0x3   :  { %v49_v12 = vld [vmem:[%s90_s2] ss:$0 sm:$0xff] }
   0x4   :  { %v24_v5 = vsub.s32 0, %v23_v4  ;;  %v40_v8 = vsub.s32 1, %v23_v4 }
   0x6   :  { %53 = vset.pattern.permute.xlu0 %v55_v2  ;;  %v25_v7 = vrot.slane %v15_v6, %v24_v5  ;;  %v41_v11 = vrot.slane %v15_v6, %v40_v8 }
   0x7   :  { %35 = vperm.xlu0 %53, %v14_v1  }
  0x7d   :  { %v20_v9 = vpop.permute.xlu0 %19 }
  0x7e   :  { %v26_v10 = vmul.f32 %v25_v7, %v20_v9 }
  0x80   :  { %v33_v14 = vadd.f32 %v49_v12, %v26_v10 }
  0x82   :  { %v36_v13 = vpop.permute.xlu0 %35 }
  0x83   :  { %v42_v15 = vmul.f32 %v41_v11, %v36_v13 }
  0x85   :  { %v43_v16 = vadd.f32 %v42_v15, %v33_v14 }
  0x87   :  { %44 = vst [vmem:[%s91_s3] sm:$0xff] %v43_v16 }

</bundles_post_ra>
